<compile_context>
chip_gen: v7x
topology: tpu7x:2x2x1
jax: 0.10.0
libtpu: 0.0.40
codegen_flags: <defaults>
</compile_context>

<pallas_src>
import jax
import jax.numpy as jnp
from jax.experimental import pallas as pl
from jax.experimental.pallas import tpu as pltpu

INPUT_SIZE = 1
HIDDEN_SIZES = [64, 32, 16]
OUTPUT_SIZE = 1

# Batch-tile cap: keeps f32 intermediates ((64+32+16)*4*tm bytes) plus the
# double-buffered (1, tm) in/out tiles well inside v5e's 16 MiB scoped VMEM.
_TM_CAP = 8192


def _make_kernel(matmul_dtype):
    def mlp_kernel(xT_ref,
                   w0_ref, b0_ref,
                   w1_ref, b1_ref,
                   w2_ref, b2_ref,
                   w3T_ref, b3_ref,
                   oT_ref):
        # Whole forward pass fused in VMEM for one batch tile; batch on lanes.
        xT = xT_ref[...].astype(jnp.float32)                                   # (1, tm)

        # Layer 0: K=1 contraction -> VPU broadcast multiply-add (no MXU pass).
        h = jnp.maximum(w0_ref[...] * xT + b0_ref[...], 0.0)                   # (64, tm)

        # Layers 1-2 on the MXU with f32 accumulation; optionally bf16 operands
        # to reduce the number of MXU passes.
        h = h.astype(matmul_dtype)
        h = jnp.dot(w1_ref[...].astype(matmul_dtype), h,
                    preferred_element_type=jnp.float32) + b1_ref[...]          # (32, tm)
        h = jnp.maximum(h, 0.0).astype(matmul_dtype)
        h = jnp.dot(w2_ref[...].astype(matmul_dtype), h,
                    preferred_element_type=jnp.float32) + b2_ref[...]          # (16, tm)
        h = jnp.maximum(h, 0.0)

        # Layer 3: 1x16 output row -> VPU multiply + sublane (XLU) reduction
        # instead of an MXU pass that would use <1% of the array.
        out = jnp.sum(w3T_ref[...] * h, axis=0, keepdims=True) + b3_ref[...]   # (1, tm)
        oT_ref[...] = out.astype(oT_ref.dtype)                                 # lane-dense store
    return mlp_kernel


def _choose_tm(batch):
    """Lane-dense (multiple of 128) batch tile.

    Large enough to amortize per-grid-step overhead; split in two even tiles when
    that adds no padding (lets v7x's two TensorCores share the "parallel" axis);
    capped so everything fits under the smallest scoped-VMEM default (v5e)."""
    b128 = ((max(batch, 1) + 127) // 128) * 128
    if b128 <= _TM_CAP:
        half = b128 // 2
        if half >= 128 and half % 128 == 0:
            return half
        return b128
    return _TM_CAP


def mlp_forward(x, params, *, tm=None, matmul_dtype=jnp.float32):
    """x: (B, INPUT_SIZE) float32.
    params: list of (W, b) in PyTorch layout: W (out, in), b (out, 1).
    tm: optional batch tile (multiple of 128); auto-chosen if None.
    matmul_dtype: operand dtype for the two MXU layers (f32 or bf16)."""
    B, in_features = x.shape
    assert in_features == INPUT_SIZE
    if tm is None:
        tm = _choose_tm(B)
    assert tm % 128 == 0, "batch tile must be lane-dense (multiple of 128)"

    (w0, b0), (w1, b1), (w2, b2), (w3, b3) = params
    # (1, 16) -> (16, 1) is a free vector reshape; lets the kernel do the final
    # layer as a broadcast multiply + sublane reduction.
    w3T = w3.reshape(HIDDEN_SIZES[-1], OUTPUT_SIZE)

    # Feature-major input: (B, 1) -> (1, B) is a free reshape (no transpose copy);
    # pad only when the batch is not a tile multiple.
    B_pad = pl.cdiv(B, tm) * tm
    xT = x.reshape(INPUT_SIZE, B)
    if B_pad != B:
        xT = jnp.pad(xT, ((0, 0), (0, B_pad - B)))

    grid = (B_pad // tm,)

    def full_spec(arr):
        return pl.BlockSpec(arr.shape, lambda i: (0, 0))

    flops = 2 * B_pad * (INPUT_SIZE * 64 + 64 * 32 + 32 * 16 + 16 * OUTPUT_SIZE)
    weight_bytes = sum(int(w.size + b.size) for w, b in params) * 4
    bytes_accessed = 4 * B_pad * (INPUT_SIZE + OUTPUT_SIZE) + weight_bytes

    outT = pl.pallas_call(
        _make_kernel(matmul_dtype),
        out_shape=jax.ShapeDtypeStruct((OUTPUT_SIZE, B_pad), x.dtype),
        grid_spec=pltpu.PrefetchScalarGridSpec(
            num_scalar_prefetch=0,
            grid=grid,
            in_specs=[
                pl.BlockSpec((INPUT_SIZE, tm), lambda i: (0, i)),
                full_spec(w0), full_spec(b0),
                full_spec(w1), full_spec(b1),
                full_spec(w2), full_spec(b2),
                full_spec(w3T), full_spec(b3),
            ],
            out_specs=pl.BlockSpec((OUTPUT_SIZE, tm), lambda i: (0, i)),
        ),
        compiler_params=pltpu.CompilerParams(
            dimension_semantics=("parallel",),
        ),
        cost_estimate=pl.CostEstimate(
            flops=flops, transcendentals=0, bytes_accessed=bytes_accessed),
    )(xT, w0, b0, w1, b1, w2, b2, w3T, b3)

    # Back to PyTorch-style (B, OUTPUT_SIZE); slice drops the batch padding,
    # reshape of the resulting vector is free.
    return outT[0, :B].reshape(B, OUTPUT_SIZE)


def init_params(key):
    """Deterministic PyTorch-style init: U(-1/sqrt(fan_in), 1/sqrt(fan_in)).
    Weights stored as (out, in); biases as (out, 1)."""
    dims = [INPUT_SIZE] + HIDDEN_SIZES + [OUTPUT_SIZE]
    params = []
    for i in range(len(dims) - 1):
        fan_in, fan_out = dims[i], dims[i + 1]
        key, kw, kb = jax.random.split(key, 3)
        bound = 1.0 / (fan_in ** 0.5)
        w = jax.random.uniform(kw, (fan_out, fan_in), jnp.float32, -bound, bound)
        b = jax.random.uniform(kb, (fan_out, 1), jnp.float32, -bound, bound)
        params.append((w, b))
    return params


def mlp_reference(x, params):
    """Pure-JAX reference in standard (batch, features) layout."""
    h = x
    for idx, (w, b) in enumerate(params):
        h = h @ w.T + b.T
        if idx < len(params) - 1:
            h = jnp.maximum(h, 0.0)
    return h


if __name__ == "__main__":
    key = jax.random.PRNGKey(0)
    key, kx1, kx2 = jax.random.split(key, 3)
    params = init_params(key)

    # Aligned batch: auto tile -> two even 256-wide tiles (even grid for v7x megacore).
    x1 = jax.random.normal(kx1, (512, INPUT_SIZE), jnp.float32)
    out1 = jax.block_until_ready(mlp_forward(x1, params))
    ref1 = mlp_reference(x1, params)
    assert out1.shape == ref1.shape
    assert jnp.allclose(out1, ref1, atol=1e-5, rtol=1e-5), "f32 mismatch (aligned batch)"

    # Ragged batch: exercises the pad-to-tile path and the final slice-off.
    x2 = jax.random.normal(kx2, (300, INPUT_SIZE), jnp.float32)
    out2 = jax.block_until_ready(mlp_forward(x2, params))
    ref2 = mlp_reference(x2, params)
    assert out2.shape == ref2.shape
    assert jnp.allclose(out2, ref2, atol=1e-5, rtol=1e-5), "f32 mismatch (ragged batch)"

    # Optional bf16 MXU operands (~3x fewer MXU passes); looser tolerance vs f32 ref.
    out3 = jax.block_until_ready(mlp_forward(x1, params, matmul_dtype=jnp.bfloat16))
    assert jnp.allclose(out3, ref1, atol=1e-1, rtol=1e-1), "bf16 mismatch"

    print("KERNEL_OK")
</pallas_src>

<mosaic_0001>
module attributes {stable_mosaic.version = 11 : i64} {
  func.func @mlp_kernel(%arg0: i32, %arg1: memref<1x256xf32, #tpu.memory_space<vmem>>, %arg2: memref<64x1xf32, #tpu.memory_space<vmem>>, %arg3: memref<64x1xf32, #tpu.memory_space<vmem>>, %arg4: memref<32x64xf32, #tpu.memory_space<vmem>>, %arg5: memref<32x1xf32, #tpu.memory_space<vmem>>, %arg6: memref<16x32xf32, #tpu.memory_space<vmem>>, %arg7: memref<16x1xf32, #tpu.memory_space<vmem>>, %arg8: memref<16x1xf32, #tpu.memory_space<vmem>>, %arg9: memref<1x1xf32, #tpu.memory_space<vmem>>, %arg10: memref<1x256xf32, #tpu.memory_space<vmem>>) attributes {dimension_semantics = [#tpu.dimension_semantics<parallel>], iteration_bounds = array<i64: 2>, scalar_prefetch = 0 : i64, scratch_operands = 0 : i64, tpu.core_type = #tpu.core_type<tc>, window_params = [{transform_indices = @transform_0, window_bounds = array<i64: 1, 256>}, {pipeline_mode = #tpu.pipeline_mode<synchronous>, transform_indices = @transform_1, window_bounds = array<i64: 64, 1>}, {pipeline_mode = #tpu.pipeline_mode<synchronous>, transform_indices = @transform_2, window_bounds = array<i64: 64, 1>}, {pipeline_mode = #tpu.pipeline_mode<synchronous>, transform_indices = @transform_3, window_bounds = array<i64: 32, 64>}, {pipeline_mode = #tpu.pipeline_mode<synchronous>, transform_indices = @transform_4, window_bounds = array<i64: 32, 1>}, {pipeline_mode = #tpu.pipeline_mode<synchronous>, transform_indices = @transform_5, window_bounds = array<i64: 16, 32>}, {pipeline_mode = #tpu.pipeline_mode<synchronous>, transform_indices = @transform_6, window_bounds = array<i64: 16, 1>}, {pipeline_mode = #tpu.pipeline_mode<synchronous>, transform_indices = @transform_7, window_bounds = array<i64: 16, 1>}, {pipeline_mode = #tpu.pipeline_mode<synchronous>, transform_indices = @transform_8, window_bounds = array<i64: 1, 1>}, {transform_indices = @transform_9, window_bounds = array<i64: 1, 256>}]} {
    %c0 = arith.constant 0 : index
    %c0_0 = arith.constant 0 : index
    %0 = vector.load %arg1[%c0, %c0_0] : memref<1x256xf32, #tpu.memory_space<vmem>>, vector<1x256xf32>
    %c0_1 = arith.constant 0 : index
    %c0_2 = arith.constant 0 : index
    %1 = vector.load %arg2[%c0_1, %c0_2] : memref<64x1xf32, #tpu.memory_space<vmem>>, vector<64x1xf32>
    %2 = vector.broadcast %1 : vector<64x1xf32> to vector<64x256xf32>
    %3 = vector.broadcast %0 : vector<1x256xf32> to vector<64x256xf32>
    %4 = arith.mulf %2, %3 : vector<64x256xf32>
    %c0_3 = arith.constant 0 : index
    %c0_4 = arith.constant 0 : index
    %5 = vector.load %arg3[%c0_3, %c0_4] : memref<64x1xf32, #tpu.memory_space<vmem>>, vector<64x1xf32>
    %6 = vector.broadcast %5 : vector<64x1xf32> to vector<64x256xf32>
    %7 = arith.addf %4, %6 : vector<64x256xf32>
    %cst = arith.constant 0.000000e+00 : f32
    %8 = vector.broadcast %cst : f32 to vector<64x256xf32>
    %9 = arith.maximumf %7, %8 : vector<64x256xf32>
    %c0_5 = arith.constant 0 : index
    %c0_6 = arith.constant 0 : index
    %10 = vector.load %arg4[%c0_5, %c0_6] : memref<32x64xf32, #tpu.memory_space<vmem>>, vector<32x64xf32>
    %cst_7 = arith.constant dense<0.000000e+00> : vector<32x256xf32>
    %11 = tpu.matmul %10, %9, %cst_7 {dimension_numbers = #tpu.dot_dimension_numbers<[1], [0], [0], [1], [0, 0, 1, 1], [], []>} : vector<32x64xf32>, vector<64x256xf32>, vector<32x256xf32> -> vector<32x256xf32>
    %c0_8 = arith.constant 0 : index
    %c0_9 = arith.constant 0 : index
    %12 = vector.load %arg5[%c0_8, %c0_9] : memref<32x1xf32, #tpu.memory_space<vmem>>, vector<32x1xf32>
    %13 = vector.broadcast %12 : vector<32x1xf32> to vector<32x256xf32>
    %14 = arith.addf %11, %13 : vector<32x256xf32>
    %cst_10 = arith.constant 0.000000e+00 : f32
    %15 = vector.broadcast %cst_10 : f32 to vector<32x256xf32>
    %16 = arith.maximumf %14, %15 : vector<32x256xf32>
    %c0_11 = arith.constant 0 : index
    %c0_12 = arith.constant 0 : index
    %17 = vector.load %arg6[%c0_11, %c0_12] : memref<16x32xf32, #tpu.memory_space<vmem>>, vector<16x32xf32>
    %cst_13 = arith.constant dense<0.000000e+00> : vector<16x256xf32>
    %18 = tpu.matmul %17, %16, %cst_13 {dimension_numbers = #tpu.dot_dimension_numbers<[1], [0], [0], [1], [0, 0, 1, 1], [], []>} : vector<16x32xf32>, vector<32x256xf32>, vector<16x256xf32> -> vector<16x256xf32>
    %c0_14 = arith.constant 0 : index
    %c0_15 = arith.constant 0 : index
    %19 = vector.load %arg7[%c0_14, %c0_15] : memref<16x1xf32, #tpu.memory_space<vmem>>, vector<16x1xf32>
    %20 = vector.broadcast %19 : vector<16x1xf32> to vector<16x256xf32>
    %21 = arith.addf %18, %20 : vector<16x256xf32>
    %cst_16 = arith.constant 0.000000e+00 : f32
    %22 = vector.broadcast %cst_16 : f32 to vector<16x256xf32>
    %23 = arith.maximumf %21, %22 : vector<16x256xf32>
    %c0_17 = arith.constant 0 : index
    %c0_18 = arith.constant 0 : index
    %24 = vector.load %arg8[%c0_17, %c0_18] : memref<16x1xf32, #tpu.memory_space<vmem>>, vector<16x1xf32>
    %25 = vector.broadcast %24 : vector<16x1xf32> to vector<16x256xf32>
    %26 = arith.mulf %25, %23 : vector<16x256xf32>
    %cst_19 = arith.constant dense<0.000000e+00> : vector<256xf32>
    %27 = vector.multi_reduction <add>, %26, %cst_19 [0] : vector<16x256xf32> to vector<256xf32>
    %28 = vector.shape_cast %27 : vector<256xf32> to vector<1x256xf32>
    %c0_20 = arith.constant 0 : index
    %c0_21 = arith.constant 0 : index
    %29 = vector.load %arg9[%c0_20, %c0_21] : memref<1x1xf32, #tpu.memory_space<vmem>>, vector<1x1xf32>
    %30 = vector.broadcast %29 : vector<1x1xf32> to vector<1x256xf32>
    %31 = arith.addf %28, %30 : vector<1x256xf32>
    %c0_22 = arith.constant 0 : index
    %c0_23 = arith.constant 0 : index
    %32 = vector.load %arg10[%c0_22, %c0_23] : memref<1x256xf32, #tpu.memory_space<vmem>>, vector<1x256xf32>
    tpu.vector_store %arg10[%c0_22, %c0_23], %31 {strides = array<i32>} : memref<1x256xf32, #tpu.memory_space<vmem>>, vector<1x256xf32>,
    return
  }
  func.func @transform_0(%arg0: i32) -> (i32, i32) {
    %c0_i32 = arith.constant 0 : i32
    %c0_i32_0 = arith.constant 0 : i32
    return %c0_i32, %arg0 : i32, i32
  }
  func.func @transform_1(%arg0: i32) -> (i32, i32) {
    %c0_i32 = arith.constant 0 : i32
    %c0_i32_0 = arith.constant 0 : i32
    %c0_i32_1 = arith.constant 0 : i32
    return %c0_i32, %c0_i32_0 : i32, i32
  }
  func.func @transform_2(%arg0: i32) -> (i32, i32) {
    %c0_i32 = arith.constant 0 : i32
    %c0_i32_0 = arith.constant 0 : i32
    %c0_i32_1 = arith.constant 0 : i32
    return %c0_i32, %c0_i32_0 : i32, i32
  }
  func.func @transform_3(%arg0: i32) -> (i32, i32) {
    %c0_i32 = arith.constant 0 : i32
    %c0_i32_0 = arith.constant 0 : i32
    %c0_i32_1 = arith.constant 0 : i32
    return %c0_i32, %c0_i32_0 : i32, i32
  }
  func.func @transform_4(%arg0: i32) -> (i32, i32) {
    %c0_i32 = arith.constant 0 : i32
    %c0_i32_0 = arith.constant 0 : i32
    %c0_i32_1 = arith.constant 0 : i32
    return %c0_i32, %c0_i32_0 : i32, i32
  }
  func.func @transform_5(%arg0: i32) -> (i32, i32) {
    %c0_i32 = arith.constant 0 : i32
    %c0_i32_0 = arith.constant 0 : i32
    %c0_i32_1 = arith.constant 0 : i32
    return %c0_i32, %c0_i32_0 : i32, i32
  }
  func.func @transform_6(%arg0: i32) -> (i32, i32) {
    %c0_i32 = arith.constant 0 : i32
    %c0_i32_0 = arith.constant 0 : i32
    %c0_i32_1 = arith.constant 0 : i32
    return %c0_i32, %c0_i32_0 : i32, i32
  }
  func.func @transform_7(%arg0: i32) -> (i32, i32) {
    %c0_i32 = arith.constant 0 : i32
    %c0_i32_0 = arith.constant 0 : i32
    %c0_i32_1 = arith.constant 0 : i32
    return %c0_i32, %c0_i32_0 : i32, i32
  }
  func.func @transform_8(%arg0: i32) -> (i32, i32) {
    %c0_i32 = arith.constant 0 : i32
    %c0_i32_0 = arith.constant 0 : i32
    %c0_i32_1 = arith.constant 0 : i32
    return %c0_i32, %c0_i32_0 : i32, i32
  }
  func.func @transform_9(%arg0: i32) -> (i32, i32) {
    %c0_i32 = arith.constant 0 : i32
    %c0_i32_0 = arith.constant 0 : i32
    return %c0_i32, %arg0 : i32, i32
  }
}

</mosaic_0001>

<bundles_post_ra>
// kernel: tpu_custom_call.1
= control target key start
LH: loop header
LB: loop body
LE: loop exit
PB: predicated region body
PF: predicated region fallthrough
CT: control target
= control target key end

     0   :  { %s1298_s0 = inlined_call_operand.vmem [shape: f32[1,512], index: 0, kind: input, shape index: {}]   ;;  %s1299_s1 = inlined_call_operand.vmem [shape: f32[64,1], index: 1, kind: input, shape index: {}]   ;;  %s1300_s2 = inlined_call_operand.vmem [shape: f32[64,1], index: 2, kind: input, shape index: {}]   ;;  %s1301_s3 = inlined_call_operand.vmem [shape: f32[32,64], index: 3, kind: input, shape index: {}]   ;;  %s1302_s4 = inlined_call_operand.vmem [shape: f32[32,1], index: 4, kind: input, shape index: {}]   ;;  %s1303_s5 = inlined_call_operand.vmem [shape: f32[16,32], index: 5, kind: input, shape index: {}]   ;;  %s1304_s6 = inlined_call_operand.vmem [shape: f32[16,1], index: 6, kind: input, shape index: {}]   ;;  %s1305_s7 = inlined_call_operand.vmem [shape: f32[16,1], index: 7, kind: input, shape index: {}]   ;;  %s1306_s8 = inlined_call_operand.<no memory space> [shape: f32[1,1], index: 8, kind: input, shape index: {}]   ;;  %s1307_s9 = inlined_call_operand.hbm [shape: f32[1,512], index: 9, kind: output, shape index: {}]  }
   0x1   :  { %v14_v0 = vstv %s1306_s8 }
   0x2   :  { %15 = vst [vmem:[#allocation2] sm:$0x1] %v14_v0 }
   0x3   :  { %16 = vsyncpa [#allocation4], 0 }
   0x4   :  { %18 = vsyncpa [#allocation4 + $0x1], 0  ;;  %s1072_s11 = smov 0   ;;  %s1074_s12 = smov 0  }
   0x5   :  { %s1076_s13 = smov 0   ;;  %s1078_s14 = smov 0  }
   0x6 LB: > { %s1093_s8 = sadd.s32 4294967295, %s1013_s14   ;;  %s865_s15 = sadd.s32 4294967294, %s1013_s14   ;;  %s1013_s14 = sphi %s1078_s14, %s1313_s14   ;;  %s1009_s13 = sphi %s1076_s13, %s1312_s13   ;;  %s1005_s12 = sphi %s1074_s12, %s1311_s12   ;;  %s1001_s11 = sphi %s1072_s11, %s1310_s11  }
   0x7   : > { %s1097_s16 = sadd.s32 1, %s1013_s14   ;;  %s225_s17 = sadd.s32 1, %s1009_s13 }
   0x8   : > { %s222_s18 = ssub.s32 %s1013_s14, %s1097_s16  ;;  %p235_p0 = scmp.ne.s32.totalorder %s1009_s13, %s1005_s12 }
   0x9   : > { %p223_p1 = scmp.eq.s32.totalorder %s222_s18, 0  ;;  %p236_p2 = scmp.eq.s32.totalorder %s1093_s8, 1 }
   0xa   : > { %p241_p3 = scmp.ne.s32.totalorder %s1005_s12, %s1001_s11  ;;  %p242_p4 = scmp.eq.s32.totalorder %s865_s15, 1 }
   0xb   : > { %s1108_s19 = scalar_select %p223_p1, %s1009_s13, %s225_s17  }
   0xc   : > { %p1110_p5 = por %p236_p2, %p235_p0  ;;  %p1114_p6 = por %p242_p4, %p241_p3 }
   0xd   : > { %p868_p7 = scmp.ge.s32.totalorder %s1013_s14, 1  ;;  %p292_p8 = scmp.lt.s32.totalorder %s1013_s14, 3 }
   0xf   : > { %p293_p9 = pnand %p868_p7, %p292_p8 }
  0x10   : > { %v409_v1 = vld [vmem:[%s1300_s2] sm:$0xff] (!%p293_p9)  ;;  %v1015_v3 = vmov (!%p293_p9), 0   ;;  %v410_v4 = vld [vmem:[%s1300_s2 + $0x8] sm:$0xff] (!%p293_p9)  ;;  %v337_v6 = vld [vmem:[%s1299_s1 + $0x18] sm:$0xff] (!%p293_p9)  ;;  %v1016_v24 = vmov (!%p293_p9), 0.0   ;;  %s870_s10 = sshll.u32 (!%p293_p9), %s1093_s8, 1  ;;  %v383_v28 = vlaneseq (!%p293_p9) }
  0x11   : > { %296 = sbr.rel (%p293_p9) target bundleno = 678 (0x2a6), region = 56  ;;  %v334_v2 = vld [vmem:[%s1299_s1] sm:$0xff] (!%p293_p9)  ;;  %950 = vset.pattern.permute.xlu1 (!%p293_p9), %v1015_v3  ;;  %949 = vset.pattern.permute.xlu0 (!%p293_p9), %v1015_v3  ;;  %v335_v5 = vld [vmem:[%s1299_s1 + $0x8] sm:$0xff] (!%p293_p9)  ;;  %v336_v7 = vld [vmem:[%s1299_s1 + $0x10] sm:$0xff] (!%p293_p9)  ;;  %p328_p10 = scmp.lt.s32.totalorder (!%p293_p9), %s870_s10, 3  ;;  %vm517_vm0 = vcmask (!%p293_p9), 523264  }
  0x12   : > { %419 = vperm.xlu1 (!%p293_p9), %950, %v409_v1   ;;  %344 = vperm.xlu0 (!%p293_p9), %949, %v334_v2   ;;  %v412_v8 = vld [vmem:[%s1300_s2 + $0x18] sm:$0xff] (!%p293_p9)  ;;  %v411_v9 = vld [vmem:[%s1300_s2 + $0x10] sm:$0xff] (!%p293_p9)  ;;  %v339_v10 = vld [vmem:[%s1299_s1 + $0x28] sm:$0xff] (!%p293_p9)  ;;  %v1196_v29 = vshrl.u32 (!%p293_p9), %v383_v28, 7  ;;  %vm641_vm1 = vcmask (!%p293_p9), 261120   ;;  %s882_s23 = sshll.u32 (!%p293_p9), %s1093_s8, 5 }
  0x13   : > { %v338_v11 = vld [vmem:[%s1299_s1 + $0x20] sm:$0xff] (!%p293_p9)  ;;  %v414_v12 = vld [vmem:[%s1300_s2 + $0x28] sm:$0xff] (!%p293_p9)  ;;  %v341_v14 = vld [vmem:[%s1299_s1 + $0x38] sm:$0xff] (!%p293_p9)  ;;  %594 = vmatprep.mubr.f32.mxu0 (!%p293_p9), %v1016_v24  ;;  %712 = vmatprep.mubr.f32.mxu1 (!%p293_p9), %v1016_v24  ;;  %vm791_vm2 = vcmp.lt.s32.totalorder (!%p293_p9), %v383_v28, 256  ;;  %s1256_s28 = scalar_lea.hbm (!%p293_p9), %s1307_s9, %s882_s23  ;;  %s1018_s8 = smov (!%p293_p9), [#allocation3]  }
  0x14   : > { %v413_v13 = vld [vmem:[%s1300_s2 + $0x20] sm:$0xff] (!%p293_p9)  ;;  %v340_v15 = vld [vmem:[%s1299_s1 + $0x30] sm:$0xff] (!%p293_p9)  ;;  %v416_v16 = vld [vmem:[%s1300_s2 + $0x38] sm:$0xff] (!%p293_p9)  ;;  %v385_v30 = vsub.s32 (!%p293_p9), 0, %v1196_v29  ;;  %v389_v31 = vsub.s32 (!%p293_p9), 1, %v1196_v29 }
  0x15   : > { %v415_v17 = vld [vmem:[%s1300_s2 + $0x30] sm:$0xff] (!%p293_p9)  ;;  %v494_v18 = vld [vmem:[%s1302_s4 + $0x8] sm:$0xff] (!%p293_p9)  ;;  %v493_v19 = vld [vmem:[%s1302_s4] sm:$0xff] (!%p293_p9) }
  0x16   : > { %424 = vperm.xlu1 (!%p293_p9), %950, %v410_v4   ;;  %349 = vperm.xlu0 (!%p293_p9), %949, %v335_v5   ;;  %v496_v20 = vld [vmem:[%s1302_s4 + $0x18] sm:$0xff] (!%p293_p9)  ;;  %v495_v21 = vld [vmem:[%s1302_s4 + $0x10] sm:$0xff] (!%p293_p9)  ;;  %v630_v22 = vld [vmem:[%s1304_s6 + $0x8] sm:$0xff] (!%p293_p9) }
  0x17   : > { %v629_v23 = vld [vmem:[%s1304_s6] sm:$0xff] (!%p293_p9)  ;;  %v730_v25 = vld [vmem:[%s1305_s7 + $0x8] sm:$0xff] (!%p293_p9) }
  0x18   : > { %v729_v26 = vld [vmem:[%s1305_s7] sm:$0xff]  ;;  %s1315_s10 = smov (!%p328_p10, %s870_s10), 3 }
  0x19   : > { %v759_v27 = vld [vmem:[#allocation2] sm:$0x1]  ;;  %s330_s18 = scalar_lea.vmem %s1298_s0, %s1315_s10  ;;  %s955_s10 = sshll.u32 %s1018_s8, 4  ;;  %s956_s10 = int_to_ptr.vmem [resolvable:$false] %s955_s10 }
  0x1a   : > { %359 = vperm.xlu1 %950, %v337_v6   ;;  %354 = vperm.xlu0 %949, %v336_v7   ;;  %v333_v32 = vld [vmem:[%s330_s18] sm:$0x3]  ;;  %s324_s18 = sand.u32 1, %s1005_s12   ;;  %s957_s15 = scalar_lea.vmem %s956_s10, 64 }
  0x1b   : > { %v1205_v33 = vrot.slane %v333_v32, %v385_v30  ;;  %v1207_v34 = vrot.slane %v333_v32, %v389_v31  ;;  %s869_s22 = sshll.u32 %s324_s18, 1  ;;  %s795_s29 = scalar_lea.sflag [#allocation4], %s324_s18 }
  0x1c   : > { %s326_s24 = scalar_lea.vmem [#allocation3], %s869_s22 }
  0x1d   : > { %s809_s25 = sshll.u32 %s326_s24, 4  ;;  %s1258_s25 = int_to_ptr.vmem [resolvable:$true] %s809_s25 }
  0x1e   : > { %434 = vperm.xlu1 %950, %v412_v8   ;;  %429 = vperm.xlu0 %949, %v411_v9   ;;  %s951_s30 = scalar_lea.vmem %s1258_s25, 32  ;;  %p958_p0 = scmp.lt.s32.totalorder %s1258_s25, %s956_s10 }
  0x1f   : > { %p952_p11 = scmp.ne.s32.totalorder %s1258_s25, %s951_s30  ;;  %p959_p1 = scmp.lt.s32.totalorder %s957_s15, %s951_s30 }
  0x21   : > { %p953_p12 = pnand %p952_p11, %p1110_p5  ;;  %p960_p2 = por %p959_p1, %p958_p0 }
  0x22   : > { %369 = vperm.xlu1 %950, %v339_v10   ;;  %364 = vperm.xlu0 %949, %v338_v11  }
  0x23   : > { %p954_p13 = pneg %p953_p12 }
  0x25   : > { %p961_p3 = pnand %p960_p2, %p954_p13 }
  0x26   : > { %444 = vperm.xlu1 %950, %v414_v12   ;;  %439 = vperm.xlu0 %949, %v413_v13  }
  0x2a   : > { %379 = vperm.xlu1 %950, %v341_v14   ;;  %374 = vperm.xlu0 %949, %v340_v15  }
  0x2e   : > { %454 = vperm.xlu1 %950, %v416_v16   ;;  %449 = vperm.xlu0 %949, %v415_v17  }
  0x32   : > { %504 = vperm.xlu1 %950, %v494_v18   ;;  %499 = vperm.xlu0 %949, %v493_v19  }
  0x36   : > { %514 = vperm.xlu1 %950, %v496_v20   ;;  %509 = vperm.xlu0 %949, %v495_v21  }
  0x3a   : > { %638 = vperm.xlu1 %950, %v630_v22   ;;  %633 = vperm.xlu0 %949, %v629_v23  }
  0x3e   : > { %738 = vperm.xlu1 %950, %v730_v25   ;;  %733 = vperm.xlu0 %949, %v729_v26  }
  0x42   : > { %762 = vperm.xlu0 %949, %v759_v27  }
  0x91   : > { %v420_v35 = vpop.permute.xlu1 %419  ;;  %v345_v36 = vpop.permute.xlu0 %344 }
  0x92   : > { %v393_v37 = vmul.f32 %v1205_v33, %v345_v36  ;;  %v394_v38 = vmul.f32 %v1207_v34, %v345_v36 }
  0x94   : > { %v457_v43 = vadd.f32 %v420_v35, %v393_v37  ;;  %v458_v44 = vadd.f32 %v420_v35, %v394_v38 }
  0x95   : > { %v425_v39 = vpop.permute.xlu1 %424  ;;  %v350_v40 = vpop.permute.xlu0 %349 }
  0x96   : > { %v395_v41 = vmul.f32 %v1205_v33, %v350_v40  ;;  %v396_v42 = vmul.f32 %v1207_v34, %v350_v40  ;;  %v474_v49 = vmax.f32 %v458_v44, 0.0  ;;  %v473_v51 = vmax.f32 %v457_v43, 0.0 }
  0x98   : > { %v459_v45 = vadd.f32 %v425_v39, %v395_v41  ;;  %v460_v46 = vadd.f32 %v425_v39, %v396_v42 }
  0x99   : > { %v360_v47 = vpop.permute.xlu1 %359  ;;  %v355_v48 = vpop.permute.xlu0 %354 }
  0x9a   : > { %v476_v50 = vmax.f32 %v460_v46, 0.0  ;;  %v475_v52 = vmax.f32 %v459_v45, 0.0  ;;  %v399_v53 = vmul.f32 %v1205_v33, %v360_v47  ;;  %v400_v54 = vmul.f32 %v1207_v34, %v360_v47 }
  0x9b   : > { %v397_v55 = vmul.f32 %v1205_v33, %v355_v48  ;;  %v398_v56 = vmul.f32 %v1207_v34, %v355_v48 }
  0x9c   : > { %v883_v59 = vpack.c.bf16 %v476_v50, %v474_v49  ;;  %v885_v60 = vpack.c.bf16 %v475_v52, %v473_v51  ;;  %v491_v49 = vld [vmem:[%s1301_s3 + $0x10] sm:$0xff]  ;;  %v492_v50 = vld [vmem:[%s1301_s3 + $0x18] sm:$0xff] }
  0x9d   : > { %v435_v57 = vpop.permute.xlu1 %434  ;;  %v430_v58 = vpop.permute.xlu0 %429 }
  0x9e   : > { %v463_v61 = vadd.f32 %v435_v57, %v399_v53  ;;  %v464_v62 = vadd.f32 %v435_v57, %v400_v54  ;;  %v461_v63 = vadd.f32 %v430_v58, %v397_v55  ;;  %v462_v0 = vadd.f32 %v430_v58, %v398_v56  ;;  %884 = vmatprep.subr.bf16.mxu0 %v883_v59 }
  0x9f   : > { %886 = vmatpush1.bf16.msra.mxu0 %v885_v60 }
  0xa0   : > { %v479_v1 = vmax.f32 %v463_v61, 0.0  ;;  %v480_v2 = vmax.f32 %v464_v62, 0.0  ;;  %v477_v3 = vmax.f32 %v461_v63, 0.0  ;;  %v478_v4 = vmax.f32 %v462_v0, 0.0 }
  0xa1   : > { %v370_v5 = vpop.permute.xlu1 %369  ;;  %v365_v6 = vpop.permute.xlu0 %364 }
  0xa2   : > { %v887_v7 = vpack.c.bf16 %v480_v2, %v478_v4  ;;  %v889_v8 = vpack.c.bf16 %v479_v1, %v477_v3  ;;  %v403_v9 = vmul.f32 %v1205_v33, %v370_v5  ;;  %v404_v10 = vmul.f32 %v1207_v34, %v370_v5 }
  0xa3   : > { %v401_v11 = vmul.f32 %v1205_v33, %v365_v6  ;;  %v402_v12 = vmul.f32 %v1207_v34, %v365_v6 }
  0xa4   : > { %888 = vmatprep.subr.bf16.mxu0 %v887_v7 }
  0xa5   : > { %v445_v13 = vpop.permute.xlu1 %444  ;;  %v440_v14 = vpop.permute.xlu0 %439  ;;  %890 = vmatpush1.bf16.msra.mxu0 %v889_v8 }
  0xa6   : > { %v467_v15 = vadd.f32 %v445_v13, %v403_v9  ;;  %v468_v16 = vadd.f32 %v445_v13, %v404_v10  ;;  %v465_v17 = vadd.f32 %v440_v14, %v401_v11  ;;  %v466_v18 = vadd.f32 %v440_v14, %v402_v12 }
  0xa8   : > { %v483_v19 = vmax.f32 %v467_v15, 0.0  ;;  %v484_v20 = vmax.f32 %v468_v16, 0.0  ;;  %v481_v21 = vmax.f32 %v465_v17, 0.0  ;;  %v482_v22 = vmax.f32 %v466_v18, 0.0 }
  0xa9   : > { %v380_v23 = vpop.permute.xlu1 %379  ;;  %v375_v25 = vpop.permute.xlu0 %374 }
  0xaa   : > { %v891_v26 = vpack.c.bf16 %v484_v20, %v482_v22  ;;  %v893_v27 = vpack.c.bf16 %v483_v19, %v481_v21  ;;  %v407_v31 = vmul.f32 %v1205_v33, %v380_v23  ;;  %v408_v32 = vmul.f32 %v1207_v34, %v380_v23  ;;  %v627_v19 = vld [vmem:[%s1303_s5] sm:$0xff]  ;;  %v628_v20 = vld [vmem:[%s1303_s5 + $0x8] sm:$0xff] }
  0xab   : > { %v405_v35 = vmul.f32 %v1205_v33, %v375_v25  ;;  %v406_v36 = vmul.f32 %v1207_v34, %v375_v25  ;;  %v489_v33 = vld [vmem:[%s1301_s3] sm:$0xff]  ;;  %v490_v34 = vld [vmem:[%s1301_s3 + $0x8] sm:$0xff] }
  0xac   : > { %892 = vmatprep.subr.bf16.mxu0 %v891_v26 }
  0xad   : > { %v455_v37 = vpop.permute.xlu1 %454  ;;  %v450_v38 = vpop.permute.xlu0 %449  ;;  %894 = vmatpush1.bf16.msra.mxu0 %v893_v27 }
  0xae   : > { %v471_v39 = vadd.f32 %v455_v37, %v407_v31  ;;  %v472_v40 = vadd.f32 %v455_v37, %v408_v32  ;;  %v469_v41 = vadd.f32 %v450_v38, %v405_v35  ;;  %v470_v42 = vadd.f32 %v450_v38, %v406_v36 }
  0xb0   : > { %v487_v43 = vmax.f32 %v471_v39, 0.0  ;;  %v488_v44 = vmax.f32 %v472_v40, 0.0  ;;  %v485_v45 = vmax.f32 %v469_v41, 0.0  ;;  %v486_v46 = vmax.f32 %v470_v42, 0.0 }
  0xb1   : > { %v500_v53 = vpop.permute.xlu0 %499  ;;  %v505_v55 = vpop.permute.xlu1 %504 }
  0xb2   : > { %v895_v47 = vpack.c.bf16 %v488_v44, %v486_v46  ;;  %v897_v48 = vpack.c.bf16 %v487_v43, %v485_v45 }
  0xb4   : > { %896 = vmatprep.subr.bf16.mxu0 %v895_v47 }
  0xb5   : > { %898 = vmatpush1.bf16.msra.mxu0 %v897_v48  ;;  %v510_v4 = vpop.permute.xlu0 %509  ;;  %v515_v7 = vpop.permute.xlu1 %514 }
  0xb8   : > { %871 = vmatmul.mubr.msk.f32.vlgmr.msra.gmra.mrb[0].mxu0 %vm517_vm0, %v489_v33 }
  0xb9   : > { %600 = vmatprep.mubr.f32.mxu0 %v1016_v24  ;;  %v634_v21 = vpop.permute.xlu0 %633  ;;  %v639_v26 = vpop.permute.xlu1 %638 }
  0xbc   : > { %872 = vmatmul.mubr.msk.f32.gmra.mrb[2].mxu0 %vm517_vm0, %v490_v34 }
  0xbd   : > { %606 = vmatprep.mubr.f32.mxu0 %v1016_v24  ;;  %v739_v40 = vpop.permute.xlu1 %738 }
  0xc0   : > { %873 = vmatmul.mubr.msk.f32.gmra.mrb[4].mxu0 %vm517_vm0, %v491_v49 }
  0xc1   : > { %612 = vmatprep.mubr.f32.mxu0 %v1016_v24 }
  0xc4   : > { %874 = vmatmul.mubr.msk.f32.gmra.mrb[6].mxu0 %vm517_vm0, %v492_v50 }
 0x18b   : > { %v596_v51 = vpop.f32.mrb[0].mxu0 }
 0x18c   : > { %v598_v52 = vpop.f32.mrb[1].mxu0  ;;  %v597_v54 = vadd.f32 %v596_v51, %v500_v53 }
 0x18d   : > { %v599_v56 = vadd.f32 %v598_v52, %v500_v53  ;;  %v1017_v52 = vmov 1966171168  }
 0x18e   : > { %v619_v61 = vmax.f32 %v597_v54, 0.0  ;;  %v775_v53 = vunpack.c.l.s4 %v1017_v52 }
 0x18f   : > { %v602_v57 = vpop.f32.mrb[2].mxu0  ;;  %v620_v63 = vmax.f32 %v599_v56, 0.0 }
 0x190   : > { %v603_v58 = vadd.f32 %v602_v57, %v505_v55  ;;  %v604_v59 = vpop.f32.mrb[3].mxu0 }
 0x191   : > { %v605_v60 = vadd.f32 %v604_v59, %v505_v55  ;;  %v776_v59 = vunpack.c.0.s8 %v775_v53 }
 0x192   : > { %v621_v62 = vmax.f32 %v603_v58, 0.0 }
 0x193   : > { %v622_v0 = vmax.f32 %v605_v60, 0.0  ;;  %v608_v1 = vpop.f32.mrb[4].mxu0 }
 0x194   : > { %v610_v2 = vpop.f32.mrb[5].mxu0  ;;  %v901_v3 = vpack.c.bf16 %v621_v62, %v619_v61  ;;  %v609_v6 = vadd.f32 %v608_v1, %v510_v4  ;;  %v779_v1 = vsub.s32 %v776_v59, %v1196_v29 }
 0x195   : > { %v899_v5 = vpack.c.bf16 %v622_v0, %v620_v63  ;;  %v611_v8 = vadd.f32 %v610_v2, %v510_v4 }
 0x196   : > { %v623_v13 = vmax.f32 %v609_v6, 0.0 }
 0x197   : > { %v614_v9 = vpop.f32.mrb[6].mxu0  ;;  %900 = vmatprep.subr.bf16.mxu1 %v899_v5  ;;  %v624_v15 = vmax.f32 %v611_v8, 0.0 }
 0x198   : > { %v615_v10 = vadd.f32 %v614_v9, %v515_v7  ;;  %v616_v11 = vpop.f32.mrb[7].mxu0  ;;  %902 = vmatpush1.bf16.msra.mxu1 %v901_v3 }
 0x199   : > { %v617_v12 = vadd.f32 %v616_v11, %v515_v7 }
 0x19a   : > { %v625_v14 = vmax.f32 %v615_v10, 0.0 }
 0x19b   : > { %v626_v16 = vmax.f32 %v617_v12, 0.0 }
 0x19c   : > { %v905_v17 = vpack.c.bf16 %v625_v14, %v623_v13 }
 0x19d   : > { %v903_v18 = vpack.c.bf16 %v626_v16, %v624_v15 }
 0x19f   : > { %904 = vmatprep.subr.bf16.mxu1 %v903_v18 }
 0x1a0   : > { %906 = vmatpush1.bf16.msra.mxu1 %v905_v17 }
 0x1a3   : > { %875 = vmatmul.mubr.msk.f32.vlgmr.msra.gmra.mrb[0].mxu1 %vm641_vm1, %v627_v19 }
 0x1a4   : > { %718 = vmatprep.mubr.f32.mxu1 %v1016_v24  ;;  %v734_v24 = vpop.permute.xlu0 %733 }
 0x1a7   : > { %876 = vmatmul.mubr.msk.f32.gmra.mrb[2].mxu1 %vm641_vm1, %v628_v20 }
 0x1a8   : > { %v763_v55 = vpop.permute.xlu0 %762 }
 0x1a9   : > { %v768_v60 = vrot.slane %v763_v55, %v385_v30 }
 0x276   : > { %v714_v22 = vpop.f32.mrb[0].mxu1 }
 0x277   : > { %v715_v23 = vadd.f32 %v714_v22, %v634_v21  ;;  %v716_v25 = vpop.f32.mrb[1].mxu1 }
 0x278   : > { %v717_v27 = vadd.f32 %v716_v25, %v634_v21 }
 0x279   : > { %v725_v32 = vmax.f32 %v715_v23, 0.0 }
 0x27a   : > { %v720_v31 = vpop.f32.mrb[2].mxu1  ;;  %v726_v37 = vmax.f32 %v717_v27, 0.0 }
 0x27b   : > { %v721_v35 = vadd.f32 %v720_v31, %v639_v26  ;;  %v722_v36 = vpop.f32.mrb[3].mxu1  ;;  %v741_v42 = vmul.f32 %v734_v24, %v725_v32 }
 0x27c   : > { %v723_v38 = vadd.f32 %v722_v36, %v639_v26  ;;  %v742_v44 = vmul.f32 %v734_v24, %v726_v37 }
 0x27d   : > { %v727_v39 = vmax.f32 %v721_v35, 0.0 }
 0x27e   : > { %v728_v41 = vmax.f32 %v723_v38, 0.0 }
 0x27f   : > { %v743_v43 = vmul.f32 %v739_v40, %v727_v39 }
 0x280   : > { %v744_v45 = vmul.f32 %v739_v40, %v728_v41 }
 0x281   : > { %v745_v46 = vadd.f32 %v743_v43, %v741_v42 }
 0x282   : > { %v752_v47 = vadd.f32 %v744_v45, %v742_v44 }
 0x283   : > { %v746_v48 = vrot.slane %v745_v46, 4 }
 0x284   : > { %v753_v33 = vrot.slane %v752_v47, 4 }
 0x285   : > { %v747_v34 = vadd.f32 %v746_v48, %v745_v46 }
 0x286   : > { %v754_v49 = vadd.f32 %v753_v33, %v752_v47 }
 0x287   : > { %v748_v50 = vrot.slane %v747_v34, 2 }
 0x288   : > { %v755_v51 = vrot.slane %v754_v49, 2 }
 0x289   : > { %v749_v54 = vadd.f32 %v748_v50, %v747_v34 }
 0x28a   : > { %v756_v56 = vadd.f32 %v755_v51, %v754_v49 }
 0x28b   : > { %v750_v57 = vrot.slane %v749_v54, 1 }
 0x28c   : > { %v757_v58 = vrot.slane %v756_v56, 1 }
 0x28d   : > { %v751_v61 = vadd.f32 %v750_v57, %v749_v54 }
 0x28e   : > { %v758_v62 = vadd.f32 %v757_v58, %v756_v56 }
 0x28f   : > { %v769_v63 = vadd.f32 %v768_v60, %v751_v61 }
 0x290   : > { %v770_v0 = vadd.f32 %v768_v60, %v758_v62 }
 0x292   : > { %v773_v2 = vcombine.low %v769_v63, %v770_v0 }
 0x294   : > { %v780_v3 = vrot.slane %v773_v2, %v779_v1 }
 0x296   : > { %v787_v4 = vrot.slane %v780_v3, %v779_v1 }
 0x298   : > { %793 = vst.msk [vmem:[%s326_s24] sm:$0x3] %vm791_vm2, %v787_v4 }
 0x299   : > { %964 = shalt.err (!%p961_p3)
}
 0x29a   : > { %s965_s17 = scalar_lea.hbm %s1256_s28, 32  ;;  %s969_s23 = scalar_lea.hbm %s1307_s9, 64 }
 0x29b   : > { %p966_p4 = scmp.ne.s32.totalorder %s1256_s28, %s965_s17  ;;  %p970_p9 = scmp.lt.u32.totalorder %s1256_s28, %s1307_s9 }
 0x29c   : > { %p971_p10 = scmp.lt.u32.totalorder %s969_s23, %s965_s17  ;;  %p973_p12 = scmp.lt.u32.totalorder %s965_s17, %s1256_s28 }
 0x29d   : > { %p967_p7 = pnand %p966_p4, %p1110_p5 }
 0x29e   : > { %p972_p11 = por %p971_p10, %p970_p9 }
 0x29f   : > { %p968_p8 = pneg %p967_p7 }
 0x2a0   : > { %p974_p13 = por %p973_p12, %p972_p11 }
 0x2a2   : > { %p975_p0 = pnand %p974_p13, %p968_p8 }
 0x2a4   : > { %978 = shalt.err (!%p975_p0)
}
 0x2a5   : > { %907 = dma.vmem_to_hbm [thread:$0]  (%p1110_p5), %s1258_s25, 32, %s1256_s28, %s795_s29  }
 0x2a6 PF: > { %p913_p1 = scmp.ge.s32.totalorder %s1013_s14, 2  ;;  %s821_s27 = sand.u32 1, %s1001_s11  }
 0x2a7   : > { %s822_s30 = scalar_lea.sflag [#allocation4], %s821_s27 }
 0x2a8   : > { %p910_p2 = pnand %p913_p1, %p1114_p6 }
 0x2aa   : > { %996 = dma.done.wait (!%p910_p2), %s822_s30, 32  }
 0x2ab   : > { %998 = vsyncadd (!%p910_p2), %s822_s30, 4294967264  ;;  %p21_p3 = scmp.ge.s32.totalorder %s1097_s16, 4   ;;  %s1310_s11 = smov %s1005_s12 }
 0x2ac   : > { %s1311_s12 = smov %s1009_s13  ;;  %s1312_s13 = smov %s1108_s19 }
 0x2ad   : > { %s1313_s14 = smov %s1097_s16  ;;  %23 = sbr.rel (!%p21_p3) target bundleno = 6 (0x6), region = 91 }
 0x2b4   :  { %827 = vsyncpa [#allocation4], 1 }
 0x2b5   :  { %829 = vsyncpa [#allocation4 + $0x1], 1 }

</bundles_post_ra>
